<compile_context>
chip_gen: v7x
topology: tpu7x:2x2x1
jax: 0.10.0
libtpu: 0.0.40
codegen_flags: <defaults>
</compile_context>

<pallas_src>
import math

import jax
import jax.numpy as jnp
from jax.experimental import pallas as pl
from jax.experimental.pallas import tpu as pltpu


_PAD_MODE = {
    "zeros": "constant",
    "constant": "constant",
    "reflect": "reflect",
    "replicate": "edge",
    "circular": "wrap",
}


def _round_up(n, m):
    return -(-n // m) * m


def _apply_padding(x, padding, padding_mode, value):
    if padding is None:
        return x
    if isinstance(padding, int):
        padding = (padding, padding)
    mode = _PAD_MODE[padding_mode]
    pads = ((0, 0), (0, 0), (int(padding[0]), int(padding[1])))
    if mode == "constant":
        cv = 0.0 if (padding_mode == "zeros" or value is None) else value
        return jnp.pad(x, pads, mode="constant", constant_values=cv)
    return jnp.pad(x, pads, mode=mode)


def _vmem_budget():
    """(tile budget, vmem_limit_bytes) sized to the current chip generation."""
    try:
        info = pltpu.get_tpu_info()
        phys = getattr(info, "vmem_capacity_bytes", None) or (64 * 1024 * 1024)
    except Exception:
        phys = 64 * 1024 * 1024
    if phys <= 64 * 1024 * 1024:
        # v7x: 64 MiB physical per TC -> stay near the 32 MiB scoped limit.
        return 20 * 1024 * 1024, 32 * 1024 * 1024
    # v5e / v6e: 128 MiB physical -> use it.
    return 80 * 1024 * 1024, 100 * 1024 * 1024


def _choose_cout_tile(C_out, C_in, K, stride, L_xp, L_out_p, n_rhs, isz, budget):
    """Pick the C_out tile so the per-grid-step VMEM footprint stays under budget."""
    rhs_rows = _round_up(n_rhs, 8)
    w_lanes = _round_up(n_rhs, 128)
    # x input block (double-buffered) + persistent rhs scratch
    fixed = 2 * stride * C_in * L_xp * isz + rhs_rows * L_out_p * isz
    # per C_out row: weights (dbl-buf, lane-padded), output (dbl-buf), f32 dot result
    per_co = 2 * w_lanes * isz + 2 * L_out_p * isz + L_out_p * 4
    avail = budget - fixed
    if avail <= 0:
        tco = 8  # TODO(synk): halo-tile L_out instead of degrading tco here.
    else:
        tco = max(8, (avail // per_co) // 8 * 8)
    return int(C_out) if tco >= C_out else int(tco)


def _make_kernel(K, C_in, dilation, stride, L_out_p, n_rhs):
    def kernel(x_ref, w_ref, o_ref, rhs_ref):
        # x_ref:   (stride, C_in, L_xp)   polyphase view of one padded batch elem
        # w_ref:   (tco, K*C_in + 1)      weight tile, bias folded into last column
        # o_ref:   (tco, L_out_p)         lane-dense output tile
        # rhs_ref: (K*C_in + 1, L_out_p)  persistent VMEM scratch (im2col rhs)
        @pl.when(pl.program_id(1) == 0)
        def _build_rhs():
            # Built once per batch element, reused for every C_out tile
            # (the j axis is "arbitrary" so the same core visits all j).
            for k in range(K):  # K is small & static -> fully unrolled
                off = k * dilation
                ph, st = off % stride, off // stride
                rhs_ref[k * C_in:(k + 1) * C_in, :] = x_ref[ph, :, st:st + L_out_p]
            # ones row so the bias column folds into the matmul
            rhs_ref[K * C_in:K * C_in + 1, :] = jnp.ones((1, L_out_p), rhs_ref.dtype)

        # Single MXU matmul, contraction depth K*C_in+1, f32 accumulation.
        o_ref[...] = jnp.dot(
            w_ref[...], rhs_ref[...], preferred_element_type=jnp.float32
        ).astype(o_ref.dtype)

    return kernel


def padded_conv1d(x, weight, bias=None, *, stride=1, padding=None, dilation=1,
                  padding_mode="zeros", value=None):
    """Forward of Padded_Conv1d: F.pad(x, padding, mode, value) followed by Conv1d."""
    B, C_in, L = x.shape
    C_out, C_in_w, K = weight.shape
    assert C_in_w == C_in, "channel mismatch"

    # 1) explicit padding (pure data movement -> wrapper side)
    x = _apply_padding(x, padding, padding_mode, value)
    L_pad = x.shape[-1]
    L_out = (L_pad - dilation * (K - 1) - 1) // stride + 1
    assert L_out > 0, "output length must be positive"

    # 2) lane-dense output: compute a multiple-of-128 output width, slice afterwards
    L_out_p = _round_up(L_out, 128)
    L_need = (L_out_p - 1) * stride + dilation * (K - 1) + 1
    # 3) polyphase split so every in-kernel tap slice is unit-stride
    L_phase = _round_up(_round_up(L_need, stride) // stride, 128)
    L_full = L_phase * stride
    if L_full >= L_pad:
        x = jnp.pad(x, ((0, 0), (0, 0), (0, L_full - L_pad)))
    else:
        x = x[:, :, :L_full]  # tail never touched by any valid tap
    # (B, stride, C_in, L_phase); phase p holds x[..., i*stride + p]
    x_ph = x.reshape(B, C_in, L_phase, stride).transpose(0, 3, 1, 2)

    # 4) weight reshaped to (C_out, K*C_in) with the bias column appended
    if bias is None:
        bias = jnp.zeros((C_out,), x.dtype)
    w2 = jnp.transpose(weight, (0, 2, 1)).reshape(C_out, K * C_in)
    w_aug = jnp.concatenate([w2, bias.reshape(C_out, 1)], axis=1).astype(x.dtype)
    n_rhs = K * C_in + 1

    isz = jnp.dtype(x.dtype).itemsize
    budget, vmem_limit = _vmem_budget()
    tco = _choose_cout_tile(C_out, C_in, K, stride, L_phase, L_out_p, n_rhs, isz, budget)
    n_co = pl.cdiv(C_out, tco)

    kernel = _make_kernel(K, C_in, dilation, stride, L_out_p, n_rhs)

    out_p = pl.pallas_call(
        kernel,
        out_shape=jax.ShapeDtypeStruct((B, C_out, L_out_p), x.dtype),
        grid_spec=pltpu.PrefetchScalarGridSpec(
            num_scalar_prefetch=0,
            grid=(B, n_co),
            in_specs=[
                # one batch element per step (batch dim squeezed), all phases/spatial
                pl.BlockSpec((None, stride, C_in, L_phase), lambda b, j: (b, 0, 0, 0)),
                # weight (+bias) slice for this C_out tile
                pl.BlockSpec((tco, n_rhs), lambda b, j: (j, 0)),
            ],
            out_specs=pl.BlockSpec((None, tco, L_out_p), lambda b, j: (b, j, 0)),
            scratch_shapes=[pltpu.VMEM((n_rhs, L_out_p), x.dtype)],
        ),
        compiler_params=pltpu.CompilerParams(
            # batch parallel (megacore); C_out-tile axis arbitrary so the per-batch
            # rhs scratch built at j==0 is reused by the same core for all j.
            dimension_semantics=("parallel", "arbitrary"),
            vmem_limit_bytes=vmem_limit,
        ),
    )(x_ph, w_aug)
    return out_p[:, :, :L_out]


def conv1d_ref(x, weight, bias, *, stride, padding, dilation,
               padding_mode="zeros", value=None):
    """Pure-JAX reference mirroring the PyTorch forward (F.pad + nn.Conv1d)."""
    x = _apply_padding(x, padding, padding_mode, value)
    out = jax.lax.conv_general_dilated(
        x, weight, window_strides=(stride,), padding="VALID",
        rhs_dilation=(dilation,), dimension_numbers=("NCH", "OIH", "NCH"))
    return out + bias[None, :, None]


if __name__ == "__main__":
    key = jax.random.PRNGKey(0)
    kx, kw, kb = jax.random.split(key, 3)

    # Small shapes consistent with the module: batch=2, in_ch=4, out_ch=8, L=16, K=3
    B, C_in, C_out, K, L = 2, 4, 8, 3, 16
    stride, padding, dilation = 1, 1, 1

    x = jax.random.normal(kx, (B, C_in, L), jnp.float32)
    bound = 1.0 / math.sqrt(C_in * K)  # matches nn.Conv1d's default init range
    w = jax.random.uniform(kw, (C_out, C_in, K), jnp.float32, -bound, bound)
    b = jax.random.uniform(kb, (C_out,), jnp.float32, -bound, bound)

    out = padded_conv1d(x, w, b, stride=stride, padding=padding,
                        dilation=dilation, padding_mode="zeros")
    out = jax.block_until_ready(out)

    ref = conv1d_ref(x, w, b, stride=stride, padding=padding, dilation=dilation,
                     padding_mode="zeros")
    assert out.shape == ref.shape == (B, C_out, L), (out.shape, ref.shape)
    assert jnp.allclose(out, ref, rtol=1e-4, atol=1e-4), "mismatch vs reference"
    print("KERNEL_OK")
</pallas_src>

<mosaic_0001>
module attributes {stable_mosaic.version = 11 : i64} {
  func.func @kernel(%arg0: i32, %arg1: i32, %arg2: memref<1x1x4x256xf32, #tpu.memory_space<vmem>>, %arg3: memref<8x13xf32, #tpu.memory_space<vmem>>, %arg4: memref<1x8x128xf32, #tpu.memory_space<vmem>>, %arg5: memref<13x128xf32, #tpu.memory_space<vmem>>) attributes {dimension_semantics = [#tpu.dimension_semantics<parallel>, #tpu.dimension_semantics<arbitrary>], iteration_bounds = array<i64: 2, 1>, scalar_prefetch = 0 : i64, scratch_operands = 1 : i64, tpu.core_type = #tpu.core_type<tc>, window_params = [{transform_indices = @transform_0, window_bounds = array<i64: 1, 1, 4, 256>}, {transform_indices = @transform_1, window_bounds = array<i64: 8, 13>}, {transform_indices = @transform_2, window_bounds = array<i64: 1, 8, 128>}]} {
    %c0_i32 = arith.constant 0 : i32
    %0 = arith.cmpi eq, %arg1, %c0_i32 : i32
    %1 = arith.extui %0 : i1 to i32
    %c0_i32_0 = arith.constant 0 : i32
    %2 = arith.cmpi ne, %1, %c0_i32_0 : i32
    scf.if %2 {
      %c0_7 = arith.constant 0 : index
      %c0_8 = arith.constant 0 : index
      %c0_9 = arith.constant 0 : index
      %c0_10 = arith.constant 0 : index
      %9 = vector.load %arg2[%c0_7, %c0_8, %c0_9, %c0_10] : memref<1x1x4x256xf32, #tpu.memory_space<vmem>>, vector<1x1x4x128xf32>
      %10 = vector.shape_cast %9 : vector<1x1x4x128xf32> to vector<4x128xf32>
      %c0_11 = arith.constant 0 : index
      %c0_12 = arith.constant 0 : index
      %11 = vector.load %arg5[%c0_11, %c0_12] : memref<13x128xf32, #tpu.memory_space<vmem>>, vector<4x128xf32>
      tpu.vector_store %arg5[%c0_11, %c0_12], %10 {strides = array<i32>} : memref<13x128xf32, #tpu.memory_space<vmem>>, vector<4x128xf32>,
      %c0_13 = arith.constant 0 : index
      %c0_14 = arith.constant 0 : index
      %c0_15 = arith.constant 0 : index
      %c1 = arith.constant 1 : index
      %12 = vector.load %arg2[%c0_13, %c0_14, %c0_15, %c1] : memref<1x1x4x256xf32, #tpu.memory_space<vmem>>, vector<1x1x4x128xf32>
      %13 = vector.shape_cast %12 : vector<1x1x4x128xf32> to vector<4x128xf32>
      %c4 = arith.constant 4 : index
      %c0_16 = arith.constant 0 : index
      %14 = vector.load %arg5[%c4, %c0_16] : memref<13x128xf32, #tpu.memory_space<vmem>>, vector<4x128xf32>
      tpu.vector_store %arg5[%c4, %c0_16], %13 {strides = array<i32>} : memref<13x128xf32, #tpu.memory_space<vmem>>, vector<4x128xf32>,
      %c0_17 = arith.constant 0 : index
      %c0_18 = arith.constant 0 : index
      %c0_19 = arith.constant 0 : index
      %c2 = arith.constant 2 : index
      %15 = vector.load %arg2[%c0_17, %c0_18, %c0_19, %c2] : memref<1x1x4x256xf32, #tpu.memory_space<vmem>>, vector<1x1x4x128xf32>
      %16 = vector.shape_cast %15 : vector<1x1x4x128xf32> to vector<4x128xf32>
      %c8 = arith.constant 8 : index
      %c0_20 = arith.constant 0 : index
      %17 = vector.load %arg5[%c8, %c0_20] : memref<13x128xf32, #tpu.memory_space<vmem>>, vector<4x128xf32>
      tpu.vector_store %arg5[%c8, %c0_20], %16 {strides = array<i32>} : memref<13x128xf32, #tpu.memory_space<vmem>>, vector<4x128xf32>,
      %cst_21 = arith.constant 1.000000e+00 : f32
      %18 = vector.broadcast %cst_21 : f32 to vector<1x128xf32>
      %c12 = arith.constant 12 : index
      %c0_22 = arith.constant 0 : index
      %19 = vector.load %arg5[%c12, %c0_22] : memref<13x128xf32, #tpu.memory_space<vmem>>, vector<1x128xf32>
      tpu.vector_store %arg5[%c12, %c0_22], %18 {strides = array<i32>} : memref<13x128xf32, #tpu.memory_space<vmem>>, vector<1x128xf32>,
    } else {
    }
    %c0 = arith.constant 0 : index
    %c0_1 = arith.constant 0 : index
    %3 = vector.load %arg3[%c0, %c0_1] : memref<8x13xf32, #tpu.memory_space<vmem>>, vector<8x13xf32>
    %c0_2 = arith.constant 0 : index
    %c0_3 = arith.constant 0 : index
    %4 = vector.load %arg5[%c0_2, %c0_3] : memref<13x128xf32, #tpu.memory_space<vmem>>, vector<13x128xf32>
    %cst = arith.constant dense<0.000000e+00> : vector<8x128xf32>
    %5 = tpu.matmul %3, %4, %cst {dimension_numbers = #tpu.dot_dimension_numbers<[1], [0], [0], [1], [0, 0, 1, 1], [], []>} : vector<8x13xf32>, vector<13x128xf32>, vector<8x128xf32> -> vector<8x128xf32>
    %c0_4 = arith.constant 0 : index
    %c0_5 = arith.constant 0 : index
    %c0_6 = arith.constant 0 : index
    %6 = vector.load %arg4[%c0_4, %c0_5, %c0_6] : memref<1x8x128xf32, #tpu.memory_space<vmem>>, vector<1x8x128xf32>
    %7 = vector.shape_cast %6 : vector<1x8x128xf32> to vector<8x128xf32>
    %8 = vector.shape_cast %5 : vector<8x128xf32> to vector<1x8x128xf32>
    tpu.vector_store %arg4[%c0_4, %c0_5, %c0_6], %8 {strides = array<i32>} : memref<1x8x128xf32, #tpu.memory_space<vmem>>, vector<1x8x128xf32>,
    return
  }
  func.func @transform_0(%arg0: i32, %arg1: i32) -> (i32, i32, i32, i32) {
    %c0_i32 = arith.constant 0 : i32
    %c0_i32_0 = arith.constant 0 : i32
    %c0_i32_1 = arith.constant 0 : i32
    %c0_i32_2 = arith.constant 0 : i32
    return %arg0, %c0_i32, %c0_i32_0, %c0_i32_1 : i32, i32, i32, i32
  }
  func.func @transform_1(%arg0: i32, %arg1: i32) -> (i32, i32) {
    %c0_i32 = arith.constant 0 : i32
    %c0_i32_0 = arith.constant 0 : i32
    return %arg1, %c0_i32 : i32, i32
  }
  func.func @transform_2(%arg0: i32, %arg1: i32) -> (i32, i32, i32) {
    %c0_i32 = arith.constant 0 : i32
    %c0_i32_0 = arith.constant 0 : i32
    return %arg0, %arg1, %c0_i32 : i32, i32, i32
  }
}

</mosaic_0001>

<bundles_post_ra>
// kernel: tpu_custom_call.1
= control target key start
LH: loop header
LB: loop body
LE: loop exit
PB: predicated region body
PF: predicated region fallthrough
CT: control target
= control target key end

     0   :  { %7 = vsyncpa [#allocation4], 0  ;;  %s916_s0 = inlined_call_operand.hbm [shape: f32[2,1,4,256], index: 0, kind: input, shape index: {}]   ;;  %s917_s1 = inlined_call_operand.hbm [shape: f32[8,13], index: 1, kind: input, shape index: {}]   ;;  %s918_s2 = inlined_call_operand.hbm [shape: f32[2,8,128], index: 2, kind: output, shape index: {}]  }
   0x1   :  { %9 = vsyncpa [#allocation4 + $0x1], 0 }
   0x2   :  { %10 = vsyncpa [#allocation7], 0 }
   0x3   :  { %11 = vsyncpa [#allocation5], 0 }
   0x4   :  { %13 = vsyncpa [#allocation5 + $0x1], 0  ;;  %s696_s9 = smov 0   ;;  %s698_s10 = smov 0  }
   0x5   :  { %s700_s11 = smov 0   ;;  %s702_s12 = smov 0  }
   0x6   :  { %s704_s13 = smov 0   ;;  %s706_s14 = smov 0  }
   0x7 LB: > { %s411_s15 = sadd.s32 4294967295, %s669_s14   ;;  %s412_s16 = sadd.s32 4294967294, %s669_s14   ;;  %s669_s14 = sphi %s706_s14, %s19_s14   ;;  %s665_s13 = sphi %s704_s13, %s943_s13   ;;  %s661_s12 = sphi %s702_s12, %s942_s12   ;;  %s657_s11 = sphi %s700_s11, %s941_s11   ;;  %s653_s10 = sphi %s698_s10, %s940_s10   ;;  %s649_s9 = sphi %s696_s9, %s939_s9  }
   0x8   : > { %p51_p0 = scmp.ne.s32.totalorder %s653_s10, %s649_s9  ;;  %p730_p1 = scmp.eq.s32.totalorder %s411_s15, 0 }
   0x9   : > { %p734_p2 = scmp.eq.s32.totalorder %s411_s15, 1  ;;  %p109_p3 = scmp.eq.s32.totalorder %s412_s16, 1 }
   0xa   : > { %s923_s17 = scalar_select %p730_p1, 1, 0 }
   0xb   : > { %s924_s18 = scalar_select %p734_p2, 1, 0 }
   0xc   : > { %p740_p4 = por %p730_p1, %p51_p0  ;;  %p413_p5 = scmp.ge.s32.totalorder %s669_s14, 1 }
   0xd   : > { %p745_p6 = por %p109_p3, %p51_p0  ;;  %p116_p7 = scmp.lt.s32.totalorder %s669_s14, 3 }
   0xe   : > { %s925_s19 = scalar_select %p740_p4, 1, 0 }
   0xf   : > { %s926_s20 = scalar_select %p745_p6, 1, 0 }
  0x10   : > { %p750_p8 = pnand %p413_p5, %p116_p7  ;;  %s671_s22 = smov [#allocation6]  }
  0x11   : > { %s131_s23 = sshll.u32 %s671_s22, 4  ;;  %s31_s25 = sadd.s32 1, %s665_s13  ;;  %s132_s23 = int_to_ptr.vmem [resolvable:$true] %s131_s23 }
  0x12   : > { %s927_s21 = scalar_select %p750_p8, 1, 0 }
  0x13   : > { %p452_p10 = pneg %p750_p8  ;;  %s38_s26 = sadd.s32 1, %s657_s11 }
  0x14   : > { %p765_p12 = scmp.ge.s32.totalorder %s31_s25, 2  ;;  %s525_s30 = scalar_lea.hbm %s917_s1, 128 }
  0x15   : > { %p759_p11 = pnand %p452_p10, %p730_p1  ;;  %p526_p13 = scmp.ne.s32.totalorder %s917_s1, %s525_s30 }
  0x16   : > { %s929_s27 = scalar_select %p765_p12, 1, 0 }
  0x17   : > { %p527_p0 = pneg %p759_p11  ;;  %p532_p7 = scmp.lt.u32.totalorder %s525_s30, %s917_s1 }
  0x19   : > { %p528_p3 = pnand %p527_p0, %p526_p13 }
  0x1b   : > { %p529_p5 = pneg %p528_p3 }
  0x1d   : > { %p534_p10 = pnand %p532_p7, %p529_p5 }
  0x1f   : > { %537 = shalt.err (!%p534_p10)
}
  0x20   : > { %s538_s7 = scalar_lea.vmem %s132_s23, 128  ;;  %p546_p4 = scmp.lt.s32.totalorder %s132_s23, %s132_s23 }
  0x21   : > { %p539_p9 = scmp.ne.s32.totalorder %s132_s23, %s538_s7  ;;  %p547_p8 = scmp.lt.s32.totalorder %s538_s7, %s538_s7 }
  0x23   : > { %p541_p6 = pnand %p539_p9, %p527_p0  ;;  %p548_p2 = por %p547_p8, %p546_p4 }
  0x25   : > { %p542_p1 = pneg %p541_p6 }
  0x27   : > { %p549_p12 = pnand %p548_p2, %p542_p1 }
  0x29   : > { %552 = shalt.err (!%p549_p12)
}
  0x2a   : > { %455 = dma.hbm_to_vmem [thread:$0]  (!%p759_p11), %s917_s1, 128, %s132_s23, [#allocation7]  }
  0x2b   : > { %p930_p4 = scmp.ne.s32.totalorder %s929_s27, 0  ;;  %p45_p1 = scmp.ne.s32.totalorder %s657_s11, %s653_s10 }
  0x2c   : > { %p46_p2 = scmp.eq.s32.totalorder %s669_s14, 0  ;;  %p465_p6 = scmp.lt.s32.totalorder %s669_s14, 2 }
  0x2d   : > { %s945_s25 = smov (%p930_p4, %s31_s25), 0  ;;  %p931_p12 = scmp.ne.s32.totalorder %s924_s18, 0 }
  0x2e   : > { %s35_s16 = ssub.s32 %s665_s13, %s945_s25  ;;  %p47_p9 = por %p46_p2, %p45_p1 }
  0x2f   : > { %p36_p8 = scmp.eq.s32.totalorder %s35_s16, 0  ;;  %p797_p13 = por %p931_p12, %p45_p1 }
  0x30   : > { %s142_s24 = sand.u32 1, %s657_s11   ;;  %s429_s27 = sshll.u32 %s665_s13, 7 }
  0x31   : > { %s805_s28 = scalar_select %p36_p8, %s657_s11, %s38_s26  }
  0x32   : > { %s416_s23 = sshll.u32 %s142_s24, 3  ;;  %s811_s3 = scalar_lea.hbm %s916_s0, %s429_s27 }
  0x33   : > { %s146_s18 = scalar_lea.vmem [#allocation3], %s416_s23  ;;  %p815_p11 = pnand %p465_p6, %p47_p9 }
  0x34   : > { %s154_s4 = sshll.u32 %s146_s18, 4  ;;  %s143_s26 = scalar_lea.sflag [#allocation4], %s142_s24  ;;  %s813_s4 = int_to_ptr.vmem [resolvable:$true] %s154_s4 }
  0x35   : > { %s553_s6 = scalar_lea.hbm %s811_s3, 128  ;;  %p555_p3 = pneg %p815_p11 }
  0x36   : > { %p554_p0 = scmp.ne.s32.totalorder %s811_s3, %s553_s6  ;;  %s558_s15 = scalar_lea.hbm %s916_s0, 256 }
  0x37   : > { %p559_p10 = scmp.lt.u32.totalorder %s811_s3, %s916_s0  ;;  %p560_p4 = scmp.lt.u32.totalorder %s558_s15, %s553_s6 }
  0x38   : > { %p556_p5 = pnand %p555_p3, %p554_p0  ;;  %p562_p2 = scmp.lt.u32.totalorder %s553_s6, %s811_s3 }
  0x39   : > { %p561_p1 = por %p560_p4, %p559_p10 }
  0x3a   : > { %p557_p7 = pneg %p556_p5 }
  0x3b   : > { %p563_p6 = por %p562_p2, %p561_p1 }
  0x3d   : > { %p564_p8 = pnand %p563_p6, %p557_p7 }
  0x3f   : > { %567 = shalt.err (!%p564_p8)
}
  0x40   : > { %s568_s24 = scalar_lea.vmem %s813_s4, 128  ;;  %s672_s27 = smov [#allocation3]  }
  0x41   : > { %p569_p9 = scmp.ne.s32.totalorder %s813_s4, %s568_s24  ;;  %s573_s29 = sshll.u32 %s672_s27, 4  ;;  %s574_s29 = int_to_ptr.vmem [resolvable:$false] %s573_s29 }
  0x42   : > { %s575_s30 = scalar_lea.vmem %s574_s29, 256  ;;  %p576_p5 = scmp.lt.s32.totalorder %s813_s4, %s574_s29 }
  0x43   : > { %p571_p12 = pnand %p569_p9, %p555_p3  ;;  %p577_p10 = scmp.lt.s32.totalorder %s575_s30, %s568_s24 }
  0x45   : > { %p572_p0 = pneg %p571_p12  ;;  %p578_p4 = por %p577_p10, %p576_p5 }
  0x47   : > { %p579_p1 = pnand %p578_p4, %p572_p0 }
  0x49   : > { %582 = shalt.err (!%p579_p1)
}
  0x4a   : > { %459 = dma.hbm_to_vmem [thread:$0]  (!%p815_p11), %s811_s3, 128, %s813_s4, %s143_s26  }
  0x4b   : > { %p934_p7 = scmp.ne.s32.totalorder %s927_s21, 0 }
  0x4c   : > { %s847_s18 = sand.u32 (!%p934_p7), 1, %s653_s10   ;;  %p935_p3 = scmp.ne.s32.totalorder (!%p934_p7), %s925_s19, 0 }
  0x4d   : > { %163 = sbr.rel (%p934_p7) target bundleno = 450 (0x1c2), region = 28  ;;  %s420_s6 = sshll.u32 (!%p934_p7), %s847_s18, 3 }
  0x4e   : > { %s166_s7 = scalar_lea.sflag (!%p934_p7), [#allocation4], %s847_s18  ;;  %s169_s8 = scalar_lea.vmem (!%p934_p7), [#allocation3], %s420_s6 }
  0x54   : > { %636 = dma.done.wait (%p935_p3), %s166_s7, 128  }
  0x55   : > { %638 = vsyncadd (%p935_p3), %s166_s7, 4294967168  ;;  %p936_p11 = scmp.ne.s32.totalorder %s923_s17, 0 }
  0x57   : > { %640 = dma.done.wait (%p936_p11), [#allocation7], 128  }
  0x58   : > { %642 = vsyncadd (%p936_p11), [#allocation7], 4294967168  ;;  %v673_v0 = vmov 1.0   ;;  %v674_v1 = vmov 0.0|0.0   ;;  %v198_v2 = vld [vmem:[%s169_s8] sm:$0xf] }
  0x59   : > { %222 = vst [vmem:[#allocation2 + $0xc] sm:$0x1] %v673_v0  ;;  %440 = vmatprep.subr.bf16.mxu0 %v674_v1  ;;  %v211_v3 = vld [vmem:[%s169_s8] sm:$0xff]  ;;  %199 = vst [vmem:[#allocation2] sm:$0xf] %v198_v2  ;;  %s675_s21 = smov 126  }
  0x5a   : > { %214 = vrot.lane.b32.xlu1 %v211_v3, %s675_s21  ;;  %v213_v4 = vcombine.high %v211_v3, %v211_v3  ;;  %s676_s3 = smov 127   ;;  %vm677_vm0 = vmmov 0   ;;  %v678_v5 = vmov 0.0   ;;  %vm218_vm1 = vcmask 1031168   ;;  %v223_v15 = vld [vmem:[#allocation6] sm:$0xff]  ;;  %s193_s17 = scalar_lea.vmem [#allocation8], %s420_s6 }
  0x5b   : > { %203 = vrot.lane.b32.xlu0 %v211_v3, %s676_s3  ;;  %437 = vmatprep.mubr.msk.f32.mxu0 %vm677_vm0, %v678_v5  ;;  %vm207_vm2 = vcmask 1039360   ;;  %vm230_vm3 = vcmask 1044480   ;;  %vm679_vm4 = vmmov 1   ;;  %vm226_vm6 = vcmask 105472   ;;  %s320_s19 = sshll.u32 %s193_s17, 4  ;;  %s426_s4 = sshll.u32 %s661_s12, 7  ;;  %s864_s19 = int_to_ptr.vmem [resolvable:$true] %s320_s19 }
  0x5c   : > { %vm442_vm5 = vmpackc.low %vm230_vm3, %vm679_vm4  ;;  %s869_s15 = scalar_lea.hbm %s918_s2, %s426_s4  ;;  %s306_s16 = scalar_lea.sflag [#allocation5], %s847_s18 }
  0x5d   : > { %s583_s23 = scalar_lea.vmem %s864_s19, 128  ;;  %s680_s12 = smov [#allocation8]  }
  0x5e   : > { %216 = vrot.lane.b32.xlu1 %v213_v4, %s675_s21  ;;  %p584_p2 = scmp.ne.s32.totalorder %s864_s19, %s583_s23  ;;  %s587_s24 = sshll.u32 %s680_s12, 4  ;;  %s588_s24 = int_to_ptr.vmem [resolvable:$false] %s587_s24 }
  0x5f   : > { %205 = vrot.lane.b32.xlu0 %v213_v4, %s676_s3  ;;  %s589_s27 = scalar_lea.vmem %s588_s24, 256  ;;  %p590_p9 = scmp.lt.s32.totalorder %s864_s19, %s588_s24 }
  0x60   : > { %p585_p6 = pnand %p584_p2, %p797_p13  ;;  %p591_p12 = scmp.lt.s32.totalorder %s589_s27, %s583_s23 }
  0x62   : > { %p586_p8 = pneg %p585_p6  ;;  %p592_p0 = por %p591_p12, %p590_p9 }
  0x64   : > { %p593_p5 = pnand %p592_p0, %p586_p8 }
  0xcc   : > { %v215_v6 = vpop.permute.xlu1 %214 }
  0xcd   : > { %v204_v7 = vpop.permute.xlu0 %203 }
  0xd0   : > { %v217_v8 = vpop.permute.xlu1 %216 }
  0xd1   : > { %v206_v9 = vpop.permute.xlu0 %205  ;;  %v219_v10 = vsel %vm218_vm1, %v215_v6, %v217_v8 }
  0xd2   : > { %v208_v11 = vsel %vm207_vm2, %v204_v7, %v206_v9  ;;  %221 = vst [vmem:[#allocation2 + $0x8] sm:$0xf] %v219_v10 }
  0xd3   : > { %210 = vst [vmem:[#allocation2 + $0x4] sm:$0xf] %v208_v11 }
  0xd9   : > { %v225_v13 = vld [vmem:[#allocation2 + $0x8] sm:$0x1f] }
  0xda   : > { %v224_v12 = vld [vmem:[#allocation2] sm:$0xff] }
  0xdb   : > { %v441_v14 = vpack.c.bf16 %v225_v13, %v224_v12 }
  0xdd   : > { %443 = vmatpush3.bf16.msk.msra.mxu0 %vm442_vm5, %v441_v14 }
  0xe0   : > { %438 = vmatmul.mubr.msk.f32.vlgmr.msra.gmra.mrb[0].mxu0 %vm226_vm6, %v223_v15 }
 0x1b3   : > { %v300_v16 = vpop.f32.mrb[0].mxu0 }
 0x1b4   : > { %304 = vst [vmem:[%s193_s17] sm:$0xff] %v300_v16  ;;  %v439_v17 = vpop.f32.mrb[1].mxu0 }
 0x1b5   : > { %596 = shalt.err (!%p593_p5)
}
 0x1b6   : > { %s597_s29 = scalar_lea.hbm %s869_s15, 128  ;;  %s601_s6 = scalar_lea.hbm %s918_s2, 256 }
 0x1b7   : > { %p598_p10 = scmp.ne.s32.totalorder %s869_s15, %s597_s29  ;;  %p602_p7 = scmp.lt.u32.totalorder %s869_s15, %s918_s2 }
 0x1b8   : > { %p603_p3 = scmp.lt.u32.totalorder %s601_s6, %s597_s29  ;;  %p605_p2 = scmp.lt.u32.totalorder %s597_s29, %s869_s15 }
 0x1b9   : > { %p599_p4 = pnand %p598_p10, %p797_p13 }
 0x1ba   : > { %p604_p11 = por %p603_p3, %p602_p7 }
 0x1bb   : > { %p600_p1 = pneg %p599_p4 }
 0x1bc   : > { %p606_p6 = por %p605_p2, %p604_p11 }
 0x1be   : > { %p607_p8 = pnand %p606_p6, %p600_p1 }
 0x1c0   : > { %610 = shalt.err (!%p607_p8)
}
 0x1c1   : > { %450 = dma.vmem_to_hbm [thread:$0]  (%p797_p13), %s864_s19, 128, %s869_s15, %s306_s16  }
 0x1c2 PF: > { %s332_s21 = sand.u32 1, %s649_s9   ;;  %p937_p9 = scmp.ne.s32.totalorder %s926_s20, 0 }
 0x1c3   : > { %p938_p12 = scmp.ge.s32.totalorder %s669_s14, 2  ;;  %s333_s3 = scalar_lea.sflag [#allocation5], %s332_s21 }
 0x1c5   : > { %p461_p0 = pnand %p938_p12, %p937_p9 }
 0x1c7   : > { %644 = dma.done.wait (!%p461_p0), %s333_s3, 128  }
 0x1c8   : > { %646 = vsyncadd (!%p461_p0), %s333_s3, 4294967168  ;;  %s19_s14 = sadd.s32 1, %s669_s14   ;;  %s939_s9 = smov %s653_s10 }
 0x1c9   : > { %p16_p5 = scmp.ge.s32.totalorder %s19_s14, 4   ;;  %s940_s10 = smov %s657_s11 }
 0x1ca   : > { %s941_s11 = smov %s805_s28  ;;  %s942_s12 = smov %s665_s13 }
 0x1cb   : > { %s943_s13 = smov %s945_s25  ;;  %18 = sbr.rel (!%p16_p5) target bundleno = 7 (0x7), region = 82 }
 0x1d2   :  { %338 = vsyncpa [#allocation4], 1 }
 0x1d3   :  { %340 = vsyncpa [#allocation4 + $0x1], 1 }
 0x1d4   :  { %341 = vsyncpa [#allocation7], 1 }
 0x1d5   :  { %342 = vsyncpa [#allocation5], 1 }
 0x1d6   :  { %344 = vsyncpa [#allocation5 + $0x1], 1 }

</bundles_post_ra>
